<compile_context>
chip_gen: v7x
topology: tpu7x:2x2x1
jax: 0.10.0
libtpu: 0.0.40
codegen_flags: <defaults>
</compile_context>

<pallas_src>
import functools

import numpy as np
import jax
import jax.numpy as jnp
from jax.experimental import pallas as pl
from jax.experimental.pallas import tpu as pltpu


def _round_up(x, m):
    return (x + m - 1) // m * m


def _vmem_budget_bytes():
    """Usable VMEM budget for the kernel working set (generation aware).

    ~48 MiB on v7x (64 MiB physical), ~96 MiB on v5e/v6e (128 MiB physical).
    Falls back to the v7x-sized budget if the query is unavailable, which is
    safe on every generation.
    """
    cap = None
    try:
        cap = getattr(pltpu.get_tpu_info(), "vmem_capacity_bytes", None)
    except Exception:
        cap = None
    if not cap:
        cap = 64 * 1024 * 1024
    return int(cap) * 3 // 4


# ----------------------------- Pallas kernels -------------------------------


def _clip_proj_kernel(x_img_ref, w_img_ref, x_txt_ref, w_txt_ref,
                      img_part_ref, txt_part_ref, acc_img_ref, acc_txt_ref,
                      *, nk_img, nk_txt, nk_half, ksplit):
    """K-tiled fused image/text projections -> per-K-half partial sums.

    Grid: (ksplit, num_M_tiles, nk_half).  The leading axis splits the K
    reduction into independent halves ("parallel"): on v7x both TensorCores
    stream disjoint weight halves even when the batch fits a single M tile; on
    single-core chips it is simply the outer loop of the same reduction.
    """
    e = pl.program_id(0)
    kl = pl.program_id(2)
    gk = e * nk_half + kl           # global K-block index
    total = ksplit * nk_half        # static

    @pl.when(kl == 0)
    def _init():
        acc_img_ref[...] = jnp.zeros_like(acc_img_ref)
        acc_txt_ref[...] = jnp.zeros_like(acc_txt_ref)

    def _acc_img():
        acc_img_ref[...] += jnp.dot(x_img_ref[...], w_img_ref[...],
                                    preferred_element_type=jnp.float32)

    def _acc_txt():
        acc_txt_ref[...] += jnp.dot(x_txt_ref[...], w_txt_ref[...],
                                    preferred_element_type=jnp.float32)

    # Each encoder only accumulates over its own (static) number of K blocks.
    if nk_img == total:
        _acc_img()
    else:
        pl.when(gk < nk_img)(_acc_img)
    if nk_txt == total:
        _acc_txt()
    else:
        pl.when(gk < nk_txt)(_acc_txt)

    @pl.when(kl == nk_half - 1)
    def _store():
        img_part_ref[...] = acc_img_ref[...]
        txt_part_ref[...] = acc_txt_ref[...]


def _clip_norm_kernel(scale_ref, img_part_ref, txt_part_ref,
                      img_out_ref, txt_out_ref):
    """Tiny epilogue: combine K-halves, L2-normalize, scale text features."""
    img = jnp.sum(img_part_ref[...], axis=0)
    # eps guards the zero-padded batch rows (rsqrt(0) -> inf -> NaN otherwise).
    ss_img = jnp.maximum(jnp.sum(img * img, axis=1, keepdims=True), 1e-30)
    img_out_ref[...] = img * jax.lax.rsqrt(ss_img)

    txt = jnp.sum(txt_part_ref[...], axis=0)
    ss_txt = jnp.maximum(jnp.sum(txt * txt, axis=1, keepdims=True), 1e-30)
    # exp(logit_scale) was precomputed once at prep time (SMEM scalar) and is
    # folded into the normalization multiply.
    txt_out_ref[...] = txt * (scale_ref[0, 0] * jax.lax.rsqrt(ss_txt))


# ------------------------------ JAX wrapper ---------------------------------


def make_clip_forward(params, *, max_batch=256, compute_dtype=jnp.bfloat16,
                      tk=None):
    """One-time weight prep + tile selection; returns a jitted forward().

    forward(image[B,C,H,W] f32, text_tokens[B,T] i32)
        -> (image_features[B,D] f32, exp(logit_scale) * text_features[B,D] f32)
    """
    w_img = params["w_img"]              # [C*H*W, D]
    w_txt = params["w_txt"]              # [T*E,   D]
    emb = params["token_embedding"]      # [V, E]
    logit_scale = params["logit_scale"]  # scalar

    K_img, D = w_img.shape
    K_txt = w_txt.shape[0]
    itemsize = jnp.dtype(compute_dtype).itemsize

    # ------------------- static tiling decisions (once) --------------------
    # Full-batch M tiles up to `max_batch` so each weight block is streamed
    # exactly once (weights dominate HBM traffic).
    tm_max = _round_up(min(max(max_batch, 16), 1024), 16)
    budget = _vmem_budget_bytes()
    if tk is None:
        tk = 4096 if D <= 512 else 2048
    tk = _round_up(tk, 128)
    # Double-buffered working-set model (bf16 weights/x, f32 acc + partials):
    #   weights 2enc*2buf*tk*D*2B + x 2enc*2buf*tm*tk*2B
    #   + acc 2enc*tm*D*4B + partial outs 2enc*2buf*tm*D*4B  <= budget
    tk_fit = (budget - 24 * tm_max * D) // (4 * itemsize * (D + tm_max))
    tk = max(128, min(tk, (tk_fit // 128) * 128))
    tk_img = min(tk, _round_up(K_img, 128))
    tk_txt = min(tk, _round_up(K_txt, 128))
    K_img_pad = _round_up(K_img, tk_img)
    K_txt_pad = _round_up(K_txt, tk_txt)
    nk_img = K_img_pad // tk_img
    nk_txt = K_txt_pad // tk_txt
    nk = max(nk_img, nk_txt)
    # Split the K reduction into two "parallel" halves so v7x's second
    # TensorCore gets work even at a single M tile; nk==1 stays unsplit.
    ksplit = 2 if nk >= 2 else 1
    nk_half = (nk + ksplit - 1) // ksplit

    # ------------- one-time weight prep (NOT in the per-call path) ---------
    def _pad2(x, rows, cols):
        return jnp.pad(x, ((0, rows - x.shape[0]), (0, cols - x.shape[1])))

    arrays = {
        "w_img": _pad2(w_img.astype(compute_dtype), K_img_pad, D),
        "w_txt": _pad2(w_txt.astype(compute_dtype), K_txt_pad, D),
        "emb": emb.astype(compute_dtype),
        "scale": jnp.exp(logit_scale).astype(jnp.float32).reshape(1, 1),
    }

    proj_kernel = functools.partial(_clip_proj_kernel, nk_img=nk_img,
                                    nk_txt=nk_txt, nk_half=nk_half,
                                    ksplit=ksplit)

    def _gk(e, k, nk_enc):
        g = e * nk_half + k
        if nk_enc == ksplit * nk_half:
            return g
        # Clamp: unchanged block index => Pallas skips the re-DMA; the
        # corresponding accumulation is gated off inside the kernel.
        return jnp.minimum(g, nk_enc - 1)

    @jax.jit
    def _fwd(image, text_tokens, arrays):
        B = image.shape[0]
        # Encoder-backbone stand-ins (glue): flatten NCHW image, embed tokens.
        x_img = image.reshape(B, K_img).astype(compute_dtype)
        x_txt = jnp.take(arrays["emb"], text_tokens, axis=0).reshape(B, K_txt)

        tm = min(_round_up(max(B, 16), 16), tm_max)
        B_pad = _round_up(B, tm)
        nm = B_pad // tm

        x_img_p = _pad2(x_img, B_pad, K_img_pad)
        x_txt_p = _pad2(x_txt, B_pad, K_txt_pad)

        flops = 2 * B_pad * (K_img_pad + K_txt_pad) * D
        bytes_accessed = (itemsize * (B_pad + D) * (K_img_pad + K_txt_pad)
                          + 4 * 2 * ksplit * B_pad * D)

        # ---- kernel 1: streaming fused projections -> partial sums ----
        img_part, txt_part = pl.pallas_call(
            proj_kernel,
            out_shape=(jax.ShapeDtypeStruct((ksplit, B_pad, D), jnp.float32),
                       jax.ShapeDtypeStruct((ksplit, B_pad, D), jnp.float32)),
            grid=(ksplit, nm, nk_half),
            in_specs=[
                # Default double buffering; pl.Buffered(3) on the two weight
                # streams is a possible sweep on v5e/v6e but costs an extra
                # tk*D*2B buffer each (budget-sensitive on v7x).
                pl.BlockSpec((tm, tk_img),
                             lambda e, m, k: (m, _gk(e, k, nk_img))),
                pl.BlockSpec((tk_img, D),
                             lambda e, m, k: (_gk(e, k, nk_img), 0)),
                pl.BlockSpec((tm, tk_txt),
                             lambda e, m, k: (m, _gk(e, k, nk_txt))),
                pl.BlockSpec((tk_txt, D),
                             lambda e, m, k: (_gk(e, k, nk_txt), 0)),
            ],
            out_specs=(pl.BlockSpec((None, tm, D), lambda e, m, k: (e, m, 0)),
                       pl.BlockSpec((None, tm, D), lambda e, m, k: (e, m, 0))),
            scratch_shapes=[pltpu.VMEM((tm, D), jnp.float32),
                            pltpu.VMEM((tm, D), jnp.float32)],
            compiler_params=pltpu.CompilerParams(
                dimension_semantics=("parallel", "parallel", "arbitrary"),
                vmem_limit_bytes=budget),
            cost_estimate=pl.CostEstimate(flops=flops, transcendentals=0,
                                          bytes_accessed=bytes_accessed),
        )(x_img_p, arrays["w_img"], x_txt_p, arrays["w_txt"])

        # ---- kernel 2: combine halves, L2-normalize, apply logit scale ----
        img_feat, txt_feat = pl.pallas_call(
            _clip_norm_kernel,
            out_shape=(jax.ShapeDtypeStruct((B_pad, D), jnp.float32),
                       jax.ShapeDtypeStruct((B_pad, D), jnp.float32)),
            grid=(nm,),
            in_specs=[
                pl.BlockSpec(memory_space=pltpu.SMEM),
                pl.BlockSpec((ksplit, tm, D), lambda m: (0, m, 0)),
                pl.BlockSpec((ksplit, tm, D), lambda m: (0, m, 0)),
            ],
            out_specs=(pl.BlockSpec((tm, D), lambda m: (m, 0)),
                       pl.BlockSpec((tm, D), lambda m: (m, 0))),
            compiler_params=pltpu.CompilerParams(
                dimension_semantics=("parallel",),
                vmem_limit_bytes=budget),
        )(arrays["scale"], img_part, txt_part)

        # Drop the zero-padded batch rows.
        return img_feat[:B], txt_feat[:B]

    def forward(image, text_tokens):
        return _fwd(image, text_tokens, arrays)

    return forward


def init_params(C, H, W, T, E, D, vocab_size):
    """Deterministic synthetic parameter init (no checkpoint loading)."""
    k = jax.random.PRNGKey(0)
    k_img, k_txt, k_emb = jax.random.split(k, 3)
    K_img = C * H * W
    K_txt = T * E
    return {
        "w_img": (jax.random.normal(k_img, (K_img, D), jnp.float32)
                  / np.sqrt(K_img)),
        "w_txt": (jax.random.normal(k_txt, (K_txt, D), jnp.float32)
                  / np.sqrt(K_txt)),
        "token_embedding": jax.random.normal(k_emb, (vocab_size, E),
                                             jnp.float32) * 0.02,
        # CLIP's canonical init: logit_scale = log(1/0.07)
        "logit_scale": jnp.asarray(np.log(1.0 / 0.07), jnp.float32),
    }


if __name__ == "__main__":
    B, C, H, W = 2, 4, 16, 16     # image: NCHW
    T, E = 8, 32                  # text: seq len / embed dim
    D = 128                       # shared CLIP feature dim (lane aligned)
    V = 64                        # tiny vocab

    key = jax.random.PRNGKey(0)
    k_im, k_tx = jax.random.split(key)
    image = jax.random.normal(k_im, (B, C, H, W), jnp.float32)
    text = jax.random.randint(k_tx, (B, T), 0, V, jnp.int32)

    params = init_params(C, H, W, T, E, D, V)

    # One-time prep (weight cast/pad, tile selection) + jitted forward.
    forward = make_clip_forward(params)
    img_feat, txt_feat_scaled = forward(image, text)
    jax.block_until_ready((img_feat, txt_feat_scaled))

    # Reference of the same math (same bf16 rounding of matmul inputs that the
    # kernel uses; accumulation / normalization stay f32).
    x_img = image.reshape(B, -1).astype(jnp.bfloat16).astype(jnp.float32)
    w_img_r = params["w_img"].astype(jnp.bfloat16).astype(jnp.float32)
    ref_img = x_img @ w_img_r
    ref_img = ref_img / jnp.linalg.norm(ref_img, axis=1, keepdims=True)

    emb_r = params["token_embedding"].astype(jnp.bfloat16).astype(jnp.float32)
    x_txt = jnp.take(emb_r, text, axis=0).reshape(B, -1)
    w_txt_r = params["w_txt"].astype(jnp.bfloat16).astype(jnp.float32)
    ref_txt = x_txt @ w_txt_r
    ref_txt = (ref_txt / jnp.linalg.norm(ref_txt, axis=1, keepdims=True)
               * jnp.exp(params["logit_scale"]))

    np.testing.assert_allclose(np.asarray(img_feat), np.asarray(ref_img),
                               rtol=2e-3, atol=2e-3)
    np.testing.assert_allclose(np.asarray(txt_feat_scaled),
                               np.asarray(ref_txt), rtol=2e-3, atol=2e-3)

    print("KERNEL_OK")
</pallas_src>

<mosaic_0001>
module attributes {stable_mosaic.version = 11 : i64} {
  func.func @_clip_proj_kernel(%arg0: i32, %arg1: i32, %arg2: i32, %arg3: memref<16x1024xbf16, #tpu.memory_space<vmem>>, %arg4: memref<1024x128xbf16, #tpu.memory_space<vmem>>, %arg5: memref<16x256xbf16, #tpu.memory_space<vmem>>, %arg6: memref<256x128xbf16, #tpu.memory_space<vmem>>, %arg7: memref<1x16x128xf32, #tpu.memory_space<vmem>>, %arg8: memref<1x16x128xf32, #tpu.memory_space<vmem>>, %arg9: memref<16x128xf32, #tpu.memory_space<vmem>>, %arg10: memref<16x128xf32, #tpu.memory_space<vmem>>) attributes {dimension_semantics = [#tpu.dimension_semantics<parallel>, #tpu.dimension_semantics<parallel>, #tpu.dimension_semantics<arbitrary>], iteration_bounds = array<i64: 1, 1, 1>, scalar_prefetch = 0 : i64, scratch_operands = 2 : i64, tpu.core_type = #tpu.core_type<tc>, window_params = [{transform_indices = @transform_0, window_bounds = array<i64: 16, 1024>}, {transform_indices = @transform_1, window_bounds = array<i64: 1024, 128>}, {transform_indices = @transform_2, window_bounds = array<i64: 16, 256>}, {transform_indices = @transform_3, window_bounds = array<i64: 256, 128>}, {transform_indices = @transform_4, window_bounds = array<i64: 1, 16, 128>}, {transform_indices = @transform_5, window_bounds = array<i64: 1, 16, 128>}]} {
    %c0_i32 = arith.constant 0 : i32
    %0 = arith.cmpi eq, %arg2, %c0_i32 : i32
    %1 = arith.extui %0 : i1 to i32
    %c0_i32_0 = arith.constant 0 : i32
    %2 = arith.cmpi ne, %1, %c0_i32_0 : i32
    scf.if %2 {
      %cst_19 = arith.constant 0.000000e+00 : f32
      %18 = vector.broadcast %cst_19 : f32 to vector<16x128xf32>
      %c0_20 = arith.constant 0 : index
      %c0_21 = arith.constant 0 : index
      %19 = vector.load %arg9[%c0_20, %c0_21] : memref<16x128xf32, #tpu.memory_space<vmem>>, vector<16x128xf32>
      tpu.vector_store %arg9[%c0_20, %c0_21], %18 {strides = array<i32>} : memref<16x128xf32, #tpu.memory_space<vmem>>, vector<16x128xf32>,
      %cst_22 = arith.constant 0.000000e+00 : f32
      %20 = vector.broadcast %cst_22 : f32 to vector<16x128xf32>
      %c0_23 = arith.constant 0 : index
      %c0_24 = arith.constant 0 : index
      %21 = vector.load %arg10[%c0_23, %c0_24] : memref<16x128xf32, #tpu.memory_space<vmem>>, vector<16x128xf32>
      tpu.vector_store %arg10[%c0_23, %c0_24], %20 {strides = array<i32>} : memref<16x128xf32, #tpu.memory_space<vmem>>, vector<16x128xf32>,
    } else {
    }
    %c0 = arith.constant 0 : index
    %c0_1 = arith.constant 0 : index
    %3 = vector.load %arg9[%c0, %c0_1] : memref<16x128xf32, #tpu.memory_space<vmem>>, vector<16x128xf32>
    %c0_2 = arith.constant 0 : index
    %c0_3 = arith.constant 0 : index
    %4 = vector.load %arg3[%c0_2, %c0_3] : memref<16x1024xbf16, #tpu.memory_space<vmem>>, vector<16x1024xbf16>
    %c0_4 = arith.constant 0 : index
    %c0_5 = arith.constant 0 : index
    %5 = vector.load %arg4[%c0_4, %c0_5] : memref<1024x128xbf16, #tpu.memory_space<vmem>>, vector<1024x128xbf16>
    %cst = arith.constant dense<0.000000e+00> : vector<16x128xf32>
    %6 = tpu.matmul %4, %5, %cst {dimension_numbers = #tpu.dot_dimension_numbers<[1], [0], [0], [1], [0, 0, 1, 1], [], []>} : vector<16x1024xbf16>, vector<1024x128xbf16>, vector<16x128xf32> -> vector<16x128xf32>
    %7 = arith.addf %3, %6 : vector<16x128xf32>
    %c0_6 = arith.constant 0 : index
    %c0_7 = arith.constant 0 : index
    %8 = vector.load %arg9[%c0_6, %c0_7] : memref<16x128xf32, #tpu.memory_space<vmem>>, vector<16x128xf32>
    tpu.vector_store %arg9[%c0_6, %c0_7], %7 {strides = array<i32>} : memref<16x128xf32, #tpu.memory_space<vmem>>, vector<16x128xf32>,
    %c0_8 = arith.constant 0 : index
    %c0_9 = arith.constant 0 : index
    %9 = vector.load %arg10[%c0_8, %c0_9] : memref<16x128xf32, #tpu.memory_space<vmem>>, vector<16x128xf32>
    %c0_10 = arith.constant 0 : index
    %c0_11 = arith.constant 0 : index
    %10 = vector.load %arg5[%c0_10, %c0_11] : memref<16x256xbf16, #tpu.memory_space<vmem>>, vector<16x256xbf16>
    %c0_12 = arith.constant 0 : index
    %c0_13 = arith.constant 0 : index
    %11 = vector.load %arg6[%c0_12, %c0_13] : memref<256x128xbf16, #tpu.memory_space<vmem>>, vector<256x128xbf16>
    %cst_14 = arith.constant dense<0.000000e+00> : vector<16x128xf32>
    %12 = tpu.matmul %10, %11, %cst_14 {dimension_numbers = #tpu.dot_dimension_numbers<[1], [0], [0], [1], [0, 0, 1, 1], [], []>} : vector<16x256xbf16>, vector<256x128xbf16>, vector<16x128xf32> -> vector<16x128xf32>
    %13 = arith.addf %9, %12 : vector<16x128xf32>
    %c0_15 = arith.constant 0 : index
    %c0_16 = arith.constant 0 : index
    %14 = vector.load %arg10[%c0_15, %c0_16] : memref<16x128xf32, #tpu.memory_space<vmem>>, vector<16x128xf32>
    tpu.vector_store %arg10[%c0_15, %c0_16], %13 {strides = array<i32>} : memref<16x128xf32, #tpu.memory_space<vmem>>, vector<16x128xf32>,
    %c0_i32_17 = arith.constant 0 : i32
    %15 = arith.cmpi eq, %arg2, %c0_i32_17 : i32
    %16 = arith.extui %15 : i1 to i32
    %c0_i32_18 = arith.constant 0 : i32
    %17 = arith.cmpi ne, %16, %c0_i32_18 : i32
    scf.if %17 {
      %c0_19 = arith.constant 0 : index
      %c0_20 = arith.constant 0 : index
      %18 = vector.load %arg9[%c0_19, %c0_20] : memref<16x128xf32, #tpu.memory_space<vmem>>, vector<16x128xf32>
      %c0_21 = arith.constant 0 : index
      %c0_22 = arith.constant 0 : index
      %c0_23 = arith.constant 0 : index
      %19 = vector.load %arg7[%c0_21, %c0_22, %c0_23] : memref<1x16x128xf32, #tpu.memory_space<vmem>>, vector<1x16x128xf32>
      %20 = vector.shape_cast %19 : vector<1x16x128xf32> to vector<16x128xf32>
      %21 = vector.shape_cast %18 : vector<16x128xf32> to vector<1x16x128xf32>
      tpu.vector_store %arg7[%c0_21, %c0_22, %c0_23], %21 {strides = array<i32>} : memref<1x16x128xf32, #tpu.memory_space<vmem>>, vector<1x16x128xf32>,
      %c0_24 = arith.constant 0 : index
      %c0_25 = arith.constant 0 : index
      %22 = vector.load %arg10[%c0_24, %c0_25] : memref<16x128xf32, #tpu.memory_space<vmem>>, vector<16x128xf32>
      %c0_26 = arith.constant 0 : index
      %c0_27 = arith.constant 0 : index
      %c0_28 = arith.constant 0 : index
      %23 = vector.load %arg8[%c0_26, %c0_27, %c0_28] : memref<1x16x128xf32, #tpu.memory_space<vmem>>, vector<1x16x128xf32>
      %24 = vector.shape_cast %23 : vector<1x16x128xf32> to vector<16x128xf32>
      %25 = vector.shape_cast %22 : vector<16x128xf32> to vector<1x16x128xf32>
      tpu.vector_store %arg8[%c0_26, %c0_27, %c0_28], %25 {strides = array<i32>} : memref<1x16x128xf32, #tpu.memory_space<vmem>>, vector<1x16x128xf32>,
    } else {
    }
    return
  }
  func.func @transform_0(%arg0: i32, %arg1: i32, %arg2: i32) -> (i32, i32) {
    %c1_i32 = arith.constant 1 : i32
    %0 = arith.muli %arg0, %c1_i32 : i32
    %1 = arith.addi %0, %arg2 : i32
    %c0_i32 = arith.constant 0 : i32
    return %arg1, %1 : i32, i32
  }
  func.func @transform_1(%arg0: i32, %arg1: i32, %arg2: i32) -> (i32, i32) {
    %c1_i32 = arith.constant 1 : i32
    %0 = arith.muli %arg0, %c1_i32 : i32
    %1 = arith.addi %0, %arg2 : i32
    %c0_i32 = arith.constant 0 : i32
    %c0_i32_0 = arith.constant 0 : i32
    return %1, %c0_i32 : i32, i32
  }
  func.func @transform_2(%arg0: i32, %arg1: i32, %arg2: i32) -> (i32, i32) {
    %c1_i32 = arith.constant 1 : i32
    %0 = arith.muli %arg0, %c1_i32 : i32
    %1 = arith.addi %0, %arg2 : i32
    %c0_i32 = arith.constant 0 : i32
    return %arg1, %1 : i32, i32
  }
  func.func @transform_3(%arg0: i32, %arg1: i32, %arg2: i32) -> (i32, i32) {
    %c1_i32 = arith.constant 1 : i32
    %0 = arith.muli %arg0, %c1_i32 : i32
    %1 = arith.addi %0, %arg2 : i32
    %c0_i32 = arith.constant 0 : i32
    %c0_i32_0 = arith.constant 0 : i32
    return %1, %c0_i32 : i32, i32
  }
  func.func @transform_4(%arg0: i32, %arg1: i32, %arg2: i32) -> (i32, i32, i32) {
    %c0_i32 = arith.constant 0 : i32
    %c0_i32_0 = arith.constant 0 : i32
    return %arg0, %arg1, %c0_i32 : i32, i32, i32
  }
  func.func @transform_5(%arg0: i32, %arg1: i32, %arg2: i32) -> (i32, i32, i32) {
    %c0_i32 = arith.constant 0 : i32
    %c0_i32_0 = arith.constant 0 : i32
    return %arg0, %arg1, %c0_i32 : i32, i32, i32
  }
}

module attributes {stable_mosaic.version = 11 : i64} {
  func.func @_clip_norm_kernel(%arg0: i32, %arg1: memref<1x1xf32, #tpu.memory_space<smem>>, %arg2: memref<1x16x128xf32, #tpu.memory_space<vmem>>, %arg3: memref<1x16x128xf32, #tpu.memory_space<vmem>>, %arg4: memref<16x128xf32, #tpu.memory_space<vmem>>, %arg5: memref<16x128xf32, #tpu.memory_space<vmem>>) attributes {dimension_semantics = [#tpu.dimension_semantics<parallel>], iteration_bounds = array<i64: 1>, scalar_prefetch = 0 : i64, scratch_operands = 0 : i64, tpu.core_type = #tpu.core_type<tc>, window_params = [{transform_indices = @transform_0, window_bounds = array<i64: 1, 1>}, {transform_indices = @transform_1, window_bounds = array<i64: 1, 16, 128>}, {transform_indices = @transform_2, window_bounds = array<i64: 1, 16, 128>}, {transform_indices = @transform_3, window_bounds = array<i64: 16, 128>}, {transform_indices = @transform_4, window_bounds = array<i64: 16, 128>}]} {
    %c0 = arith.constant 0 : index
    %c0_0 = arith.constant 0 : index
    %c0_1 = arith.constant 0 : index
    %0 = vector.load %arg2[%c0, %c0_0, %c0_1] : memref<1x16x128xf32, #tpu.memory_space<vmem>>, vector<1x16x128xf32>
    %cst = arith.constant dense<0.000000e+00> : vector<16x128xf32>
    %1 = vector.multi_reduction <add>, %0, %cst [0] : vector<1x16x128xf32> to vector<16x128xf32>
    %2 = arith.mulf %1, %1 : vector<16x128xf32>
    %cst_2 = arith.constant dense<0.000000e+00> : vector<16xf32>
    %3 = vector.multi_reduction <add>, %2, %cst_2 [1] : vector<16x128xf32> to vector<16xf32>
    %4 = vector.shape_cast %3 : vector<16xf32> to vector<16x1xf32>
    %cst_3 = arith.constant 1.000000e-30 : f32
    %5 = vector.broadcast %cst_3 : f32 to vector<16x1xf32>
    %6 = arith.maximumf %4, %5 : vector<16x1xf32>
    %7 = math.rsqrt %6 : vector<16x1xf32>
    %8 = vector.broadcast %7 : vector<16x1xf32> to vector<16x128xf32>
    %9 = arith.mulf %1, %8 : vector<16x128xf32>
    %c0_4 = arith.constant 0 : index
    %c0_5 = arith.constant 0 : index
    %10 = vector.load %arg4[%c0_4, %c0_5] : memref<16x128xf32, #tpu.memory_space<vmem>>, vector<16x128xf32>
    tpu.vector_store %arg4[%c0_4, %c0_5], %9 {strides = array<i32>} : memref<16x128xf32, #tpu.memory_space<vmem>>, vector<16x128xf32>,
    %c0_6 = arith.constant 0 : index
    %c0_7 = arith.constant 0 : index
    %c0_8 = arith.constant 0 : index
    %11 = vector.load %arg3[%c0_6, %c0_7, %c0_8] : memref<1x16x128xf32, #tpu.memory_space<vmem>>, vector<1x16x128xf32>
    %cst_9 = arith.constant dense<0.000000e+00> : vector<16x128xf32>
    %12 = vector.multi_reduction <add>, %11, %cst_9 [0] : vector<1x16x128xf32> to vector<16x128xf32>
    %13 = arith.mulf %12, %12 : vector<16x128xf32>
    %cst_10 = arith.constant dense<0.000000e+00> : vector<16xf32>
    %14 = vector.multi_reduction <add>, %13, %cst_10 [1] : vector<16x128xf32> to vector<16xf32>
    %15 = vector.shape_cast %14 : vector<16xf32> to vector<16x1xf32>
    %cst_11 = arith.constant 1.000000e-30 : f32
    %16 = vector.broadcast %cst_11 : f32 to vector<16x1xf32>
    %17 = arith.maximumf %15, %16 : vector<16x1xf32>
    %c0_12 = arith.constant 0 : index
    %c0_13 = arith.constant 0 : index
    %18 = memref.load %arg1[%c0_12, %c0_13] : memref<1x1xf32, #tpu.memory_space<smem>>
    %19 = math.rsqrt %17 : vector<16x1xf32>
    %20 = vector.broadcast %18 : f32 to vector<16x1xf32>
    %21 = arith.mulf %20, %19 : vector<16x1xf32>
    %22 = vector.broadcast %21 : vector<16x1xf32> to vector<16x128xf32>
    %23 = arith.mulf %12, %22 : vector<16x128xf32>
    %c0_14 = arith.constant 0 : index
    %c0_15 = arith.constant 0 : index
    %24 = vector.load %arg5[%c0_14, %c0_15] : memref<16x128xf32, #tpu.memory_space<vmem>>, vector<16x128xf32>
    tpu.vector_store %arg5[%c0_14, %c0_15], %23 {strides = array<i32>} : memref<16x128xf32, #tpu.memory_space<vmem>>, vector<16x128xf32>,
    return
  }
  func.func @transform_0(%arg0: i32) -> (i32, i32) {
    %c0_i32 = arith.constant 0 : i32
    %c0_i32_0 = arith.constant 0 : i32
    %c0_i32_1 = arith.constant 0 : i32
    return %c0_i32, %c0_i32_0 : i32, i32
  }
  func.func @transform_1(%arg0: i32) -> (i32, i32, i32) {
    %c0_i32 = arith.constant 0 : i32
    %c0_i32_0 = arith.constant 0 : i32
    %c0_i32_1 = arith.constant 0 : i32
    return %c0_i32, %arg0, %c0_i32_0 : i32, i32, i32
  }
  func.func @transform_2(%arg0: i32) -> (i32, i32, i32) {
    %c0_i32 = arith.constant 0 : i32
    %c0_i32_0 = arith.constant 0 : i32
    %c0_i32_1 = arith.constant 0 : i32
    return %c0_i32, %arg0, %c0_i32_0 : i32, i32, i32
  }
  func.func @transform_3(%arg0: i32) -> (i32, i32) {
    %c0_i32 = arith.constant 0 : i32
    %c0_i32_0 = arith.constant 0 : i32
    return %arg0, %c0_i32 : i32, i32
  }
  func.func @transform_4(%arg0: i32) -> (i32, i32) {
    %c0_i32 = arith.constant 0 : i32
    %c0_i32_0 = arith.constant 0 : i32
    return %arg0, %c0_i32 : i32, i32
  }
}

</mosaic_0001>

<bundles_post_ra>
// kernel: _fwd.3
= control target key start
LH: loop header
LB: loop body
LE: loop exit
PB: predicated region body
PF: predicated region fallthrough
CT: control target
= control target key end

     0   :  { %s125_s2 = inlined_call_operand.vmem [shape: f32[1,16,128], index: 2, kind: input, shape index: {}]   ;;  %s126_s1 = inlined_call_operand.vmem [shape: f32[1,16,128], index: 1, kind: input, shape index: {}]   ;;  %s127_s0 = inlined_call_operand.<no memory space> [shape: f32[1,1], index: 0, kind: input, shape index: {}]   ;;  %s128_s3 = inlined_call_operand.vmem [shape: f32[16,128], index: 3, kind: output, shape index: {0}]   ;;  %s129_s4 = inlined_call_operand.vmem [shape: f32[16,128], index: 4, kind: output, shape index: {1}]  }
   0x1   :  { %v35_v0 = vld [vmem:[%s125_s2] sm:$0xff]  ;;  %v36_v2 = vld [vmem:[%s125_s2 + $0x8] sm:$0xff]  ;;  %v50_v16 = vstv %s127_s0 }
   0x2   :  { %v17_v1 = vld [vmem:[%s126_s1] sm:$0xff]  ;;  %v39_v3 = vmul.f32 %v35_v0, %v35_v0  ;;  %v18_v5 = vld [vmem:[%s126_s1 + $0x8] sm:$0xff]  ;;  %v40_v6 = vmul.f32 %v36_v2, %v36_v2 }
   0x3   :  { %v21_v4 = vmul.f32 %v17_v1, %v17_v1  ;;  %v22_v7 = vmul.f32 %v18_v5, %v18_v5 }
   0x4   :  { %41 = vadd.xlane.f32.xlu0 %v39_v3 }
   0x5   :  { %23 = vadd.xlane.f32.xlu1 %v21_v4 }
   0x8   :  { %43 = vadd.xlane.f32.xlu0 %v40_v6 }
   0x9   :  { %25 = vadd.xlane.f32.xlu1 %v22_v7 }
  0x91   :  { %v42_v8 = vpop.xlane.xlu0 %41 }
  0x92   :  { %v24_v9 = vpop.xlane.xlu1 %23  ;;  %v45_v10 = vmax.f32 %v42_v8, 1e-30 }
  0x93   :  { %v27_v11 = vmax.f32 %v24_v9, 1e-30 }
  0x94   :  { %65 = vrsqrt.f32 %v45_v10 }
  0x95   :  { %67 = vrsqrt.f32 %v27_v11  ;;  %v44_v12 = vpop.xlane.xlu0 %43 }
  0x96   :  { %v26_v13 = vpop.xlane.xlu1 %25  ;;  %v46_v14 = vmax.f32 %v44_v12, 1e-30 }
  0x97   :  { %v28_v15 = vmax.f32 %v26_v13, 1e-30 }
  0x98   :  { %69 = vrsqrt.f32 %v46_v14 }
  0x99   :  { %71 = vrsqrt.f32 %v28_v15 }
  0x9e   :  { %v66_v17 = vpop.eup %65 }
  0x9f   :  { %v68_v18 = vpop.eup %67  ;;  %v51_v19 = vmul.f32 %v66_v17, %v50_v16 }
  0xa0   :  { %v31_v20 = vmul.f32 %v68_v18, %v17_v1 }
  0xa1   :  { %v53_v21 = vmul.f32 %v51_v19, %v35_v0 }
  0xa2   :  { %v70_v22 = vpop.eup %69  ;;  %33 = vst [vmem:[%s128_s3] sm:$0xff] %v31_v20 }
  0xa3   :  { %v72_v23 = vpop.eup %71  ;;  %55 = vst [vmem:[%s129_s4] sm:$0xff] %v53_v21  ;;  %v52_v24 = vmul.f32 %v70_v22, %v50_v16 }
  0xa4   :  { %v32_v25 = vmul.f32 %v72_v23, %v18_v5 }
  0xa5   :  { %v54_v26 = vmul.f32 %v52_v24, %v36_v2 }
  0xa6   :  { %34 = vst [vmem:[%s128_s3 + $0x8] sm:$0xff] %v32_v25 }
  0xa7   :  { %56 = vst [vmem:[%s129_s4 + $0x8] sm:$0xff] %v54_v26 }

// kernel: _fwd.2
= control target key start
LH: loop header
LB: loop body
LE: loop exit
PB: predicated region body
PF: predicated region fallthrough
CT: control target
= control target key end

     0   :  { %11 = vsyncpa [#allocation5], 0  ;;  %s1379_s18 = smov [#allocation4]   ;;  %s1658_s0 = inlined_call_operand.vmem [shape: bf16[16,1024], index: 0, kind: input, shape index: {}]   ;;  %s1659_s1 = inlined_call_operand.vmem [shape: bf16[1024,128], index: 1, kind: input, shape index: {}]   ;;  %s1660_s2 = inlined_call_operand.vmem [shape: bf16[16,256], index: 2, kind: input, shape index: {}]   ;;  %s1661_s3 = inlined_call_operand.hbm [shape: bf16[256,128], index: 3, kind: input, shape index: {}]   ;;  %s1662_s4 = inlined_call_operand.vmem [shape: f32[1,16,128], index: 4, kind: output, shape index: {0}]   ;;  %s1663_s5 = inlined_call_operand.vmem [shape: f32[1,16,128], index: 5, kind: output, shape index: {1}]  }
   0x1   :  { %s51_s19 = sshll.u32 %s1379_s18, 4  ;;  %s1355_s22 = scalar_lea.hbm %s1661_s3, 2048  ;;  %s52_s19 = int_to_ptr.vmem [resolvable:$true] %s51_s19 }
   0x2   :  { %p1356_p0 = scmp.ne.s32.totalorder %s1661_s3, %s1355_s22  ;;  %p1359_p1 = scmp.lt.u32.totalorder %s1355_s22, %s1661_s3 }
   0x4   :  { %p1361_p2 = pnand %p1359_p1, %p1356_p0 }
   0x6   :  { %1364 = shalt.err (!%p1361_p2)
}
   0x7   :  { %s1365_s27 = scalar_lea.vmem %s52_s19, 2048  ;;  %p1370_p4 = scmp.lt.s32.totalorder %s52_s19, %s52_s19 }
   0x8   :  { %p1366_p3 = scmp.ne.s32.totalorder %s52_s19, %s1365_s27  ;;  %p1371_p5 = scmp.lt.s32.totalorder %s1365_s27, %s1365_s27 }
   0xa   :  { %p1372_p6 = por %p1371_p5, %p1370_p4 }
   0xc   :  { %p1373_p7 = pnand %p1372_p6, %p1366_p3 }
   0xe   :  { %1376 = shalt.err (!%p1373_p7)
}
   0xf   :  { %s1380_s28 = smov 64   ;;  %s1381_s29 = smov 4  }
  0x10   :  { %57 = dma.hbm_to_vmem [thread:$0]  %s1661_s3, 2048, %s52_s19, [#allocation5], %s1380_s28, %s1380_s28, %s1381_s29  }
  0x11   :  { %1377 = dma.done.wait [#allocation5], 2048  }
  0x12   :  { %1378 = vsyncadd [#allocation5], 4294965248  ;;  %v1272_v0 = vld [vmem:[%s1659_s1 + $0x40] sm:$0xff]   ;;  %v1276_v4 = vld [vmem:[%s1659_s1 + $0x48] sm:$0xff]  }
  0x13   :  { %v1273_v1 = vld [vmem:[%s1659_s1 + $0xc0] sm:$0xff]   ;;  %1159 = vmatprep.subr.bf16.mxu0 %v1272_v0  ;;  %v1277_v5 = vld [vmem:[%s1659_s1 + $0xc8] sm:$0xff]   ;;  %v1280_v8 = vld [vmem:[%s1659_s1 + $0x50] sm:$0xff]  }
  0x14   :  { %v1274_v2 = vld [vmem:[%s1659_s1] sm:$0xff]   ;;  %1181 = vmatprep.subr.bf16.mxu1 %v1273_v1  ;;  %v1278_v6 = vld [vmem:[%s1659_s1 + $0x8] sm:$0xff]   ;;  %v1281_v9 = vld [vmem:[%s1659_s1 + $0xd0] sm:$0xff]  }
  0x15   :  { %v1275_v3 = vld [vmem:[%s1659_s1 + $0x80] sm:$0xff]   ;;  %1160 = vmatpush3.bf16.msra.mxu0 %v1274_v2  ;;  %v1279_v7 = vld [vmem:[%s1659_s1 + $0x88] sm:$0xff]   ;;  %v1282_v10 = vld [vmem:[%s1659_s1 + $0x10] sm:$0xff]  }
  0x16   :  { %1182 = vmatpush3.bf16.msra.mxu1 %v1275_v3  ;;  %1161 = vmatprep.subr.bf16.mxu0 %v1276_v4  ;;  %v1283_v11 = vld [vmem:[%s1659_s1 + $0x90] sm:$0xff]   ;;  %v1284_v12 = vld [vmem:[%s1659_s1 + $0x58] sm:$0xff]   ;;  %v1288_v16 = vld [vmem:[%s1659_s1 + $0x60] sm:$0xff]  }
  0x17   :  { %1183 = vmatprep.subr.bf16.mxu1 %v1277_v5  ;;  %v1285_v13 = vld [vmem:[%s1659_s1 + $0xd8] sm:$0xff]   ;;  %v1289_v17 = vld [vmem:[%s1659_s1 + $0xe0] sm:$0xff]   ;;  %v1292_v20 = vld [vmem:[%s1659_s1 + $0x68] sm:$0xff]  }
  0x18   :  { %v1286_v14 = vld [vmem:[%s1659_s1 + $0x18] sm:$0xff]   ;;  %v1290_v18 = vld [vmem:[%s1659_s1 + $0x20] sm:$0xff]   ;;  %v1293_v21 = vld [vmem:[%s1659_s1 + $0xe8] sm:$0xff]  }
  0x19   :  { %1162 = vmatpush3.bf16.msra.mxu0 %v1278_v6  ;;  %v1287_v15 = vld [vmem:[%s1659_s1 + $0x98] sm:$0xff]   ;;  %v1291_v19 = vld [vmem:[%s1659_s1 + $0xa0] sm:$0xff]   ;;  %v1294_v22 = vld [vmem:[%s1659_s1 + $0x28] sm:$0xff]  }
  0x1a   :  { %1184 = vmatpush3.bf16.msra.mxu1 %v1279_v7  ;;  %1163 = vmatprep.subr.bf16.mxu0 %v1280_v8  ;;  %v1295_v23 = vld [vmem:[%s1659_s1 + $0xa8] sm:$0xff]   ;;  %v1296_v24 = vld [vmem:[%s1659_s1 + $0x70] sm:$0xff]   ;;  %v1300_v28 = vld [vmem:[%s1659_s1 + $0x78] sm:$0xff]  }
  0x1b   :  { %1185 = vmatprep.subr.bf16.mxu1 %v1281_v9  ;;  %v1297_v25 = vld [vmem:[%s1659_s1 + $0xf0] sm:$0xff]   ;;  %v1301_v29 = vld [vmem:[%s1659_s1 + $0xf8] sm:$0xff]   ;;  %v116_v32 = vld [vmem:[%s1658_s0] sm:$0xff] }
  0x1c   :  { %v1298_v26 = vld [vmem:[%s1659_s1 + $0x30] sm:$0xff]   ;;  %v1302_v30 = vld [vmem:[%s1659_s1 + $0x38] sm:$0xff]   ;;  %v120_v33 = vld [vmem:[%s1658_s0 + $0x20] sm:$0xff] }
  0x1d   :  { %1164 = vmatpush3.bf16.msra.mxu0 %v1282_v10  ;;  %v1299_v27 = vld [vmem:[%s1659_s1 + $0xb0] sm:$0xff]   ;;  %v1303_v31 = vld [vmem:[%s1659_s1 + $0xb8] sm:$0xff]   ;;  %v117_v34 = vld [vmem:[%s1658_s0 + $0x8] sm:$0xff]  ;;  %v1069_v35 = vcombine.low %v116_v32, %v120_v33  ;;  %v1070_v36 = vcombine.high %v116_v32, %v120_v33 }
  0x1e   :  { %1186 = vmatpush3.bf16.msra.mxu1 %v1283_v11  ;;  %1165 = vmatprep.subr.bf16.mxu0 %v1284_v12  ;;  %v121_v37 = vld [vmem:[%s1658_s0 + $0x28] sm:$0xff]  ;;  %v1304_v40 = vld [vmem:[%s1659_s1 + $0x140] sm:$0xff]   ;;  %v1312_v48 = vld [vmem:[%s1659_s1 + $0x150] sm:$0xff]  }
  0x1f   :  { %1187 = vmatprep.subr.bf16.mxu1 %v1285_v13  ;;  %v1071_v38 = vcombine.low %v117_v34, %v121_v37  ;;  %v1072_v39 = vcombine.high %v117_v34, %v121_v37  ;;  %708 = vmatprep.mubr.bf16.mxu0 %v1070_v36  ;;  %v1305_v41 = vld [vmem:[%s1659_s1 + $0x100] sm:$0xff]   ;;  %v1308_v44 = vld [vmem:[%s1659_s1 + $0x148] sm:$0xff]   ;;  %v1313_v49 = vld [vmem:[%s1659_s1 + $0x110] sm:$0xff]  }
  0x20   :  { %v1306_v42 = vld [vmem:[%s1659_s1 + $0x1c0] sm:$0xff]   ;;  %v1309_v45 = vld [vmem:[%s1659_s1 + $0x108] sm:$0xff]   ;;  %v1314_v50 = vld [vmem:[%s1659_s1 + $0x1d0] sm:$0xff]  }
  0x21   :  { %1166 = vmatpush3.bf16.msra.mxu0 %v1286_v14  ;;  %749 = vmatprep.mubr.bf16.mxu1 %v1072_v39  ;;  %v1307_v43 = vld [vmem:[%s1659_s1 + $0x180] sm:$0xff]   ;;  %v1310_v46 = vld [vmem:[%s1659_s1 + $0x1c8] sm:$0xff]   ;;  %v1315_v51 = vld [vmem:[%s1659_s1 + $0x190] sm:$0xff]  }
  0x22   :  { %1188 = vmatpush3.bf16.msra.mxu1 %v1287_v15  ;;  %1167 = vmatprep.subr.bf16.mxu0 %v1288_v16  ;;  %v1311_v47 = vld [vmem:[%s1659_s1 + $0x188] sm:$0xff]   ;;  %v1316_v52 = vld [vmem:[%s1659_s1 + $0x158] sm:$0xff]   ;;  %v1320_v56 = vld [vmem:[%s1659_s1 + $0x160] sm:$0xff]  }
  0x23   :  { %1189 = vmatprep.subr.bf16.mxu1 %v1289_v17  ;;  %v1317_v53 = vld [vmem:[%s1659_s1 + $0x118] sm:$0xff]   ;;  %v1321_v57 = vld [vmem:[%s1659_s1 + $0x120] sm:$0xff]   ;;  %v1324_v60 = vld [vmem:[%s1659_s1 + $0x168] sm:$0xff]  }
  0x24   :  { %v1318_v54 = vld [vmem:[%s1659_s1 + $0x1d8] sm:$0xff]   ;;  %v1322_v58 = vld [vmem:[%s1659_s1 + $0x1e0] sm:$0xff]   ;;  %v1325_v61 = vld [vmem:[%s1659_s1 + $0x128] sm:$0xff]  }
  0x25   :  { %1168 = vmatpush3.bf16.msra.mxu0 %v1290_v18  ;;  %v1319_v55 = vld [vmem:[%s1659_s1 + $0x198] sm:$0xff]   ;;  %v1323_v59 = vld [vmem:[%s1659_s1 + $0x1a0] sm:$0xff]   ;;  %v1326_v62 = vld [vmem:[%s1659_s1 + $0x1e8] sm:$0xff]  }
  0x26   :  { %1190 = vmatpush3.bf16.msra.mxu1 %v1291_v19  ;;  %1169 = vmatprep.subr.bf16.mxu0 %v1292_v20  ;;  %v1327_v63 = vld [vmem:[%s1659_s1 + $0x1a8] sm:$0xff]   ;;  %v1328_v0 = vld [vmem:[%s1659_s1 + $0x170] sm:$0xff]   ;;  %v1332_v4 = vld [vmem:[%s1659_s1 + $0x178] sm:$0xff]  }
  0x27   :  { %1191 = vmatprep.subr.bf16.mxu1 %v1293_v21  ;;  %v1329_v1 = vld [vmem:[%s1659_s1 + $0x130] sm:$0xff]   ;;  %v1333_v5 = vld [vmem:[%s1659_s1 + $0x138] sm:$0xff]   ;;  %v1336_v12 = vld [vmem:[#allocation4 + $0x40] sm:$0xff]  }
  0x28   :  { %v1330_v2 = vld [vmem:[%s1659_s1 + $0x1f0] sm:$0xff]   ;;  %v1334_v6 = vld [vmem:[%s1659_s1 + $0x1f8] sm:$0xff]   ;;  %v1337_v17 = vld [vmem:[#allocation4] sm:$0xff]  }
  0x29   :  { %1170 = vmatpush3.bf16.msra.mxu0 %v1294_v22  ;;  %v1331_v3 = vld [vmem:[%s1659_s1 + $0x1b0] sm:$0xff]   ;;  %v1335_v11 = vld [vmem:[%s1659_s1 + $0x1b8] sm:$0xff]   ;;  %v1338_v18 = vld [vmem:[#allocation4 + $0x48] sm:$0xff]  }
  0x2a   :  { %1192 = vmatpush3.bf16.msra.mxu1 %v1295_v23  ;;  %1171 = vmatprep.subr.bf16.mxu0 %v1296_v24  ;;  %v118_v7 = vld [vmem:[%s1658_s0 + $0x10] sm:$0xff]  ;;  %v119_v13 = vld [vmem:[%s1658_s0 + $0x18] sm:$0xff]  ;;  %v1339_v19 = vld [vmem:[#allocation4 + $0x8] sm:$0xff]  }
  0x2b   :  { %1193 = vmatprep.subr.bf16.mxu1 %v1297_v25  ;;  %v122_v8 = vld [vmem:[%s1658_s0 + $0x30] sm:$0xff]  ;;  %v123_v14 = vld [vmem:[%s1658_s0 + $0x38] sm:$0xff]  ;;  %v1344_v24 = vld [vmem:[#allocation4 + $0x60] sm:$0xff]  }
  0x2c   :  { %v1073_v9 = vcombine.low %v118_v7, %v122_v8  ;;  %v1074_v10 = vcombine.high %v118_v7, %v122_v8  ;;  %v1075_v15 = vcombine.low %v119_v13, %v123_v14  ;;  %v1076_v16 = vcombine.high %v119_v13, %v123_v14  ;;  %v1340_v20 = vld [vmem:[#allocation4 + $0x50] sm:$0xff]   ;;  %v1342_v22 = vld [vmem:[#allocation4 + $0x58] sm:$0xff]   ;;  %v1345_v25 = vld [vmem:[#allocation4 + $0x20] sm:$0xff]  }
  0x2d   :  { %1172 = vmatpush3.bf16.msra.mxu0 %v1298_v26  ;;  %v1341_v21 = vld [vmem:[#allocation4 + $0x10] sm:$0xff]   ;;  %v1343_v23 = vld [vmem:[#allocation4 + $0x18] sm:$0xff]   ;;  %v1346_v26 = vld [vmem:[#allocation4 + $0x68] sm:$0xff]  }
  0x2e   :  { %1194 = vmatpush3.bf16.msra.mxu1 %v1299_v27  ;;  %1173 = vmatprep.subr.bf16.mxu0 %v1300_v28  ;;  %v1354_v27 = vld [vmem:[%s1660_s2 + $0x4] ss:$8 sps:$4 sm:$0xff]   ;;  %v1351_v32 = vld [vmem:[#allocation4 + $0x38] sm:$0xff]   ;;  %v1352_v33 = vld [vmem:[%s1660_s2] ss:$8 sps:$4 sm:$0xff]  }
  0x2f   :  { %1195 = vmatprep.subr.bf16.mxu1 %v1301_v29  ;;  %v1347_v28 = vld [vmem:[#allocation4 + $0x28] sm:$0xff]   ;;  %v1348_v29 = vld [vmem:[#allocation4 + $0x70] sm:$0xff]  }
  0x31   :  { %1174 = vmatpush3.bf16.msra.mxu0 %v1302_v30  ;;  %v1349_v30 = vld [vmem:[#allocation4 + $0x30] sm:$0xff]  }
  0x32   :  { %1196 = vmatpush3.bf16.msra.mxu1 %v1303_v31  ;;  %1203 = vmatprep.subr.bf16.mxu0 %v1304_v40  ;;  %v1350_v31 = vld [vmem:[#allocation4 + $0x78] sm:$0xff]  }
  0x33   :  { %1225 = vmatprep.subr.bf16.mxu1 %v1306_v42 }
  0x34   :  { %709 = vmatmul.mubr.bf16.vlgmr.msra.gmra.mrb[0].mxu0 %v1069_v35 }
  0x35   :  { %750 = vmatmul.mubr.bf16.vlgmr.msra.gmra.mrb[0].mxu1 %v1071_v38  ;;  %1204 = vmatpush3.bf16.msra.mxu0 %v1305_v41 }
  0x36   :  { %1226 = vmatpush3.bf16.msra.mxu1 %v1307_v43  ;;  %1205 = vmatprep.subr.bf16.mxu0 %v1308_v44 }
  0x37   :  { %1227 = vmatprep.subr.bf16.mxu1 %v1310_v46  ;;  %790 = vmatprep.mubr.bf16.mxu0 %v1074_v10 }
  0x38   :  { %831 = vmatprep.mubr.bf16.mxu1 %v1076_v16 }
  0x39   :  { %1206 = vmatpush3.bf16.msra.mxu0 %v1309_v45 }
  0x3a   :  { %1228 = vmatpush3.bf16.msra.mxu1 %v1311_v47  ;;  %1207 = vmatprep.subr.bf16.mxu0 %v1312_v48 }
  0x3b   :  { %1229 = vmatprep.subr.bf16.mxu1 %v1314_v50 }
  0x3d   :  { %1208 = vmatpush3.bf16.msra.mxu0 %v1313_v49 }
  0x3e   :  { %1230 = vmatpush3.bf16.msra.mxu1 %v1315_v51  ;;  %1209 = vmatprep.subr.bf16.mxu0 %v1316_v52 }
  0x3f   :  { %1231 = vmatprep.subr.bf16.mxu1 %v1318_v54 }
  0x41   :  { %1210 = vmatpush3.bf16.msra.mxu0 %v1317_v53 }
  0x42   :  { %1232 = vmatpush3.bf16.msra.mxu1 %v1319_v55  ;;  %1211 = vmatprep.subr.bf16.mxu0 %v1320_v56 }
  0x43   :  { %1233 = vmatprep.subr.bf16.mxu1 %v1322_v58 }
  0x45   :  { %1212 = vmatpush3.bf16.msra.mxu0 %v1321_v57 }
  0x46   :  { %1234 = vmatpush3.bf16.msra.mxu1 %v1323_v59  ;;  %1213 = vmatprep.subr.bf16.mxu0 %v1324_v60 }
  0x47   :  { %1235 = vmatprep.subr.bf16.mxu1 %v1326_v62 }
  0x49   :  { %1214 = vmatpush3.bf16.msra.mxu0 %v1325_v61 }
  0x4a   :  { %1236 = vmatpush3.bf16.msra.mxu1 %v1327_v63  ;;  %1215 = vmatprep.subr.bf16.mxu0 %v1328_v0 }
  0x4b   :  { %1237 = vmatprep.subr.bf16.mxu1 %v1330_v2 }
  0x4d   :  { %1216 = vmatpush3.bf16.msra.mxu0 %v1329_v1 }
  0x4e   :  { %1238 = vmatpush3.bf16.msra.mxu1 %v1331_v3  ;;  %1217 = vmatprep.subr.bf16.mxu0 %v1332_v4 }
  0x4f   :  { %1239 = vmatprep.subr.bf16.mxu1 %v1334_v6 }
  0x51   :  { %1218 = vmatpush3.bf16.msra.mxu0 %v1333_v5 }
  0x52   :  { %1240 = vmatpush3.bf16.msra.mxu1 %v1335_v11  ;;  %1247 = vmatprep.subr.bf16.mxu0 %v1336_v12 }
  0x54   :  { %791 = vmatmul.mubr.bf16.vlgmr.msra.gmra.mrb[4].mxu0 %v1073_v9 }
  0x55   :  { %1248 = vmatpush3.bf16.msra.mxu0 %v1337_v17  ;;  %832 = vmatmul.mubr.bf16.vlgmr.msra.gmra.mrb[4].mxu1 %v1075_v15 }
  0x56   :  { %1249 = vmatprep.subr.bf16.mxu0 %v1338_v18  ;;  %1018 = vmatprep.mubr.bf16.mxu0 %v1354_v27 }
  0x59   :  { %1250 = vmatpush3.bf16.msra.mxu0 %v1339_v19 }
  0x5a   :  { %1251 = vmatprep.subr.bf16.mxu0 %v1340_v20 }
  0x5d   :  { %1252 = vmatpush3.bf16.msra.mxu0 %v1341_v21 }
  0x5e   :  { %1253 = vmatprep.subr.bf16.mxu0 %v1342_v22 }
  0x61   :  { %1254 = vmatpush3.bf16.msra.mxu0 %v1343_v23 }
  0x62   :  { %1255 = vmatprep.subr.bf16.mxu0 %v1344_v24 }
  0x65   :  { %1256 = vmatpush3.bf16.msra.mxu0 %v1345_v25 }
  0x66   :  { %1257 = vmatprep.subr.bf16.mxu0 %v1346_v26 }
  0x69   :  { %1258 = vmatpush3.bf16.msra.mxu0 %v1347_v28 }
  0x6a   :  { %1259 = vmatprep.subr.bf16.mxu0 %v1348_v29 }
  0x6d   :  { %1260 = vmatpush3.bf16.msra.mxu0 %v1349_v30 }
  0x6e   :  { %1261 = vmatprep.subr.bf16.mxu0 %v1350_v31 }
  0x71   :  { %1262 = vmatpush3.bf16.msra.mxu0 %v1351_v32 }
  0x74   :  { %1019 = vmatmul.mubr.bf16.vlgmr.msra.gmra.mrb[8].mxu0 %v1352_v33 }
 0x107   :  { %v1175_v34 = vpop.f32.mrb[0].mxu0 }
 0x108   :  { %v1197_v35 = vpop.f32.mrb[0].mxu1  ;;  %v1176_v36 = vpop.f32.mrb[1].mxu0 }
 0x109   :  { %v1177_v37 = vadd.f32 %v1176_v36, %v1175_v34  ;;  %v1198_v38 = vpop.f32.mrb[1].mxu1  ;;  %v1178_v39 = vpop.f32.mrb[2].mxu0 }
 0x10a   :  { %v1199_v40 = vadd.f32 %v1198_v38, %v1197_v35  ;;  %v1200_v41 = vpop.f32.mrb[2].mxu1  ;;  %v1179_v42 = vpop.f32.mrb[3].mxu0 }
 0x10b   :  { %v1180_v43 = vadd.f32 %v1179_v42, %v1178_v39  ;;  %v1201_v44 = vpop.f32.mrb[3].mxu1 }
 0x10c   :  { %v752_v45 = vadd.f32 %v1199_v40, %v1177_v37  ;;  %v1202_v46 = vadd.f32 %v1201_v44, %v1200_v41 }
 0x10e   :  { %v755_v47 = vadd.f32 %v1202_v46, %v1180_v43 }
 0x127   :  { %v1219_v48 = vpop.f32.mrb[4].mxu0 }
 0x128   :  { %v1220_v49 = vpop.f32.mrb[5].mxu0  ;;  %v1241_v52 = vpop.f32.mrb[4].mxu1 }
 0x129   :  { %v1221_v50 = vadd.f32 %v1220_v49, %v1219_v48  ;;  %v1222_v51 = vpop.f32.mrb[6].mxu0  ;;  %v1242_v54 = vpop.f32.mrb[5].mxu1 }
 0x12a   :  { %v1223_v53 = vpop.f32.mrb[7].mxu0  ;;  %v1243_v57 = vadd.f32 %v1242_v54, %v1241_v52  ;;  %v1244_v58 = vpop.f32.mrb[6].mxu1 }
 0x12b   :  { %v793_v55 = vadd.f32 %v1221_v50, %v752_v45  ;;  %v1224_v56 = vadd.f32 %v1223_v53, %v1222_v51  ;;  %v1245_v59 = vpop.f32.mrb[7].mxu1 }
 0x12c   :  { %v1246_v62 = vadd.f32 %v1245_v59, %v1244_v58 }
 0x12d   :  { %v796_v60 = vadd.f32 %v1224_v56, %v755_v47  ;;  %v834_v61 = vadd.f32 %v1243_v57, %v793_v55 }
 0x12f   :  { %1036 = vst [vmem:[%s1662_s4] sm:$0xff] %v834_v61  ;;  %v837_v63 = vadd.f32 %v1246_v62, %v796_v60 }
 0x131   :  { %1037 = vst [vmem:[%s1662_s4 + $0x8] sm:$0xff] %v837_v63 }
 0x147   :  { %v1263_v0 = vpop.f32.mrb[8].mxu0 }
 0x148   :  { %v1264_v1 = vpop.f32.mrb[9].mxu0 }
 0x149   :  { %v1265_v2 = vadd.f32 %v1264_v1, %v1263_v0  ;;  %v1266_v3 = vpop.f32.mrb[10].mxu0 }
 0x14a   :  { %v1267_v4 = vpop.f32.mrb[11].mxu0 }
 0x14b   :  { %1040 = vst [vmem:[%s1663_s5] sm:$0xff] %v1265_v2  ;;  %v1268_v5 = vadd.f32 %v1267_v4, %v1266_v3 }
 0x14d   :  { %1041 = vst [vmem:[%s1663_s5 + $0x8] sm:$0xff] %v1268_v5 }
 0x14e   :  { %1050 = vsyncpa [#allocation5], 1 }

</bundles_post_ra>
